<compile_context>
chip_gen: v6e
topology: v6e:2x2x1
jax: 0.10.0
libtpu: 0.0.40
codegen_flags: <defaults>
</compile_context>

<pallas_src>
import functools

import jax
import jax.numpy as jnp
from jax import lax
from jax.experimental import pallas as pl
from jax.experimental.pallas import tpu as pltpu

LOG_SIG_MAX = 2.0
LOG_SIG_MIN = -20.0
SIGMA_MULTIPLIER = 1.0
_LANE = 128


def _policy_kernel(x_ref, w_trunk_ref, b_trunk_ref, w_head_ref, b_head_ref,
                   out_ref, *, num_hidden_layers, output_dim):
    """Whole forward pass: uniform (B,H)@(H,H) trunk + 128-lane fused head."""
    h = x_ref[...]
    # Trunk: num_hidden_layers identical Linear+ReLU layers (weights stacked).
    for i in range(num_hidden_layers):
        h = jnp.maximum(
            jnp.dot(h, w_trunk_ref[i], preferred_element_type=jnp.float32)
            + b_trunk_ref[i], 0.0)

    # Fused head: one matmul producing [mu_logits | log_sigma_logits | 0-pad]
    head = (jnp.dot(h, w_head_ref[...], preferred_element_type=jnp.float32)
            + b_head_ref[...])

    # Lane-index select: lanes [0, output_dim) -> tanh (mu),
    # lanes [output_dim, 128) -> exp(clamp(.)) * SIGMA_MULTIPLIER (sigma /
    # inert padding).  tanh/exp run on the EUP slot; keep the clip (bounds exp).
    col = lax.broadcasted_iota(jnp.int32, head.shape, 1)
    mu = jnp.tanh(head)
    sigma = jnp.exp(jnp.clip(head, LOG_SIG_MIN, LOG_SIG_MAX)) * SIGMA_MULTIPLIER
    out_ref[...] = jnp.where(col < output_dim, mu, sigma).astype(out_ref.dtype)


def _xavier_uniform(key, fan_in, fan_out, dtype=jnp.float32):
    # Matches torch.nn.init.xavier_uniform_ (gain=1.0); stored (in, out) so the
    # kernel computes x @ W directly.
    limit = (6.0 / (fan_in + fan_out)) ** 0.5
    return jax.random.uniform(key, (fan_in, fan_out), dtype=dtype,
                              minval=-limit, maxval=limit)


def init_raw_params(key, input_dim, hidden_dim, output_dim, num_hidden_layers=4):
    """PyTorch-equivalent (unpadded) parameters."""
    keys = jax.random.split(key, num_hidden_layers + 2)
    w_in = _xavier_uniform(keys[0], input_dim, hidden_dim)
    w_hid = [_xavier_uniform(keys[i + 1], hidden_dim, hidden_dim)
             for i in range(num_hidden_layers - 1)]
    b_trunk = [jnp.full((hidden_dim,), 0.01, jnp.float32)
               for _ in range(num_hidden_layers)]
    w_mu = _xavier_uniform(keys[num_hidden_layers], hidden_dim, output_dim)
    b_mu = jnp.zeros((output_dim,), jnp.float32)
    w_ls = _xavier_uniform(keys[num_hidden_layers + 1], hidden_dim, output_dim)
    b_ls = jnp.full((output_dim,), -1.0, jnp.float32)
    return dict(w_in=w_in, w_hid=w_hid, b_trunk=b_trunk,
                w_mu=w_mu, b_mu=b_mu, w_ls=w_ls, b_ls=b_ls)


def pack_params(raw, input_dim, hidden_dim, output_dim, num_hidden_layers=4):
    """Pad / stack raw params into the kernel layout."""
    # TODO(synk): unified trunk slab assumes input_dim <= hidden_dim; keep a
    #             separate w_in input for the (rare) input_dim > hidden_dim case.
    assert input_dim <= hidden_dim, "unified trunk slab requires input_dim <= hidden_dim"
    head_width = max(_LANE, pl.cdiv(2 * output_dim, _LANE) * _LANE)

    # Layer 0 weight: zero-pad rows input_dim -> hidden_dim (inert against the
    # zero-padded x columns), then stack with hidden-layer weights.
    w_in_p = jnp.pad(raw["w_in"], ((0, hidden_dim - input_dim), (0, 0)))
    w_trunk = jnp.stack([w_in_p] + raw["w_hid"], axis=0)            # (L, H, H)
    b_trunk = jnp.stack([b.reshape(1, hidden_dim) for b in raw["b_trunk"]],
                        axis=0)                                     # (L, 1, H)

    # Fused, lane-dense head: [mu | log_sigma | zero-pad] -> (H, head_width).
    w_head = jnp.concatenate([raw["w_mu"], raw["w_ls"]], axis=1)
    w_head = jnp.pad(w_head, ((0, 0), (0, head_width - 2 * output_dim)))
    b_head = jnp.concatenate([raw["b_mu"], raw["b_ls"]]).reshape(1, -1)
    b_head = jnp.pad(b_head, ((0, 0), (0, head_width - 2 * output_dim)))
    return dict(w_trunk=w_trunk, b_trunk=b_trunk, w_head=w_head, b_head=b_head)


@functools.partial(jax.jit,
                   static_argnames=("output_dim", "num_hidden_layers", "batch_tile"))
def policy_forward(x, params, *, output_dim, num_hidden_layers=4, batch_tile=None):
    batch, input_dim = x.shape
    hidden_dim = params["w_trunk"].shape[-1]
    head_width = params["w_head"].shape[-1]

    # Zero-pad the feature dim so every trunk matmul is (B, H) @ (H, H).
    if input_dim < hidden_dim:
        x = jnp.pad(x, ((0, 0), (0, hidden_dim - input_dim)))

    kernel = functools.partial(_policy_kernel,
                               num_hidden_layers=num_hidden_layers,
                               output_dim=output_dim)
    inputs = (x, params["w_trunk"], params["b_trunk"],
              params["w_head"], params["b_head"])

    flops = 2 * batch * (num_hidden_layers * hidden_dim * hidden_dim
                         + hidden_dim * head_width)
    transcendentals = 2 * batch * head_width            # tanh + exp over slab
    bytes_accessed = 4 * (sum(int(a.size) for a in inputs) + batch * head_width)
    cost = pl.CostEstimate(flops=flops, transcendentals=transcendentals,
                           bytes_accessed=bytes_accessed)

    out_shape = jax.ShapeDtypeStruct((batch, head_width), jnp.float32)

    if batch_tile is None or batch_tile >= batch:
        # Default (v5e/v6e single TC, and any small/medium batch): gridless,
        # everything VMEM-resident, single invocation — footprint is tiny
        # (~2 MiB at batch=2048 after lane padding), grid steps would be pure
        # ~0.35us/step overhead.
        vmem = pl.BlockSpec(memory_space=pltpu.MemorySpace.VMEM)
        fused = pl.pallas_call(
            kernel,
            out_shape=out_shape,
            in_specs=[vmem] * len(inputs),
            out_specs=vmem,
            cost_estimate=cost,
        )(*inputs)
    else:
        # Dual-TC (v7x) large-batch path: a short "parallel" grid over batch
        # (pass batch_tile = batch // 2 for exactly 2 steps).  Weights/biases
        # stay VMEM-resident via constant index_maps.  VMEM is not a
        # constraint here; pick the largest tile that amortizes step overhead.
        tb = batch_tile
        fused = pl.pallas_call(
            kernel,
            out_shape=out_shape,
            grid_spec=pltpu.PrefetchScalarGridSpec(
                num_scalar_prefetch=0,
                grid=(pl.cdiv(batch, tb),),
                in_specs=[
                    pl.BlockSpec((tb, hidden_dim), lambda i: (i, 0)),
                    pl.BlockSpec(params["w_trunk"].shape, lambda i: (0, 0, 0)),
                    pl.BlockSpec(params["b_trunk"].shape, lambda i: (0, 0, 0)),
                    pl.BlockSpec(params["w_head"].shape, lambda i: (0, 0)),
                    pl.BlockSpec(params["b_head"].shape, lambda i: (0, 0)),
                ],
                out_specs=pl.BlockSpec((tb, head_width), lambda i: (i, 0)),
            ),
            compiler_params=pltpu.CompilerParams(
                dimension_semantics=("parallel",)),
            cost_estimate=cost,
        )(*inputs)

    # Never return the raw padded slab — slice exactly the real lanes.
    mu = fused[:, :output_dim]
    sigma = fused[:, output_dim:2 * output_dim]
    return mu, sigma


def _reference_forward(x, raw, output_dim, num_hidden_layers=4):
    # Pure-JAX reference built from the UNPADDED parameters.
    h = jnp.maximum(x @ raw["w_in"] + raw["b_trunk"][0], 0.0)
    for i in range(num_hidden_layers - 1):
        h = jnp.maximum(h @ raw["w_hid"][i] + raw["b_trunk"][i + 1], 0.0)
    mu = jnp.tanh(h @ raw["w_mu"] + raw["b_mu"])
    log_sigma = jnp.clip(h @ raw["w_ls"] + raw["b_ls"], LOG_SIG_MIN, LOG_SIG_MAX)
    sigma = jnp.exp(log_sigma) * SIGMA_MULTIPLIER
    return mu, sigma


if __name__ == "__main__":
    input_dim, hidden_dim, output_dim = 16, 32, 8
    num_hidden_layers = 4

    key = jax.random.PRNGKey(0)
    k_x, k_p, k_x2 = jax.random.split(key, 3)
    raw = init_raw_params(k_p, input_dim, hidden_dim, output_dim, num_hidden_layers)
    params = pack_params(raw, input_dim, hidden_dim, output_dim, num_hidden_layers)

    # --- small batch: gridless latency path ------------------------------
    batch = 8
    x = jax.random.normal(k_x, (batch, input_dim), dtype=jnp.float32)
    mu, sigma = policy_forward(x, params, output_dim=output_dim,
                               num_hidden_layers=num_hidden_layers)
    jax.block_until_ready((mu, sigma))
    mu_ref, sigma_ref = _reference_forward(x, raw, output_dim, num_hidden_layers)
    assert mu.shape == (batch, output_dim) and sigma.shape == (batch, output_dim)
    assert jnp.allclose(mu, mu_ref, atol=1e-5), "mu mismatch (gridless)"
    assert jnp.allclose(sigma, sigma_ref, atol=1e-5), "sigma mismatch (gridless)"

    # --- large batch: 2-step parallel grid (v7x dual-TC style) -----------
    big_batch = 2048
    x_big = jax.random.normal(k_x2, (big_batch, input_dim), dtype=jnp.float32)
    mu_b, sigma_b = policy_forward(x_big, params, output_dim=output_dim,
                                   num_hidden_layers=num_hidden_layers,
                                   batch_tile=big_batch // 2)
    jax.block_until_ready((mu_b, sigma_b))
    mu_bref, sigma_bref = _reference_forward(x_big, raw, output_dim,
                                             num_hidden_layers)
    assert jnp.allclose(mu_b, mu_bref, atol=1e-5), "mu mismatch (tiled)"
    assert jnp.allclose(sigma_b, sigma_bref, atol=1e-5), "sigma mismatch (tiled)"

    print("KERNEL_OK")
</pallas_src>

<mosaic_0001>
module attributes {stable_mosaic.version = 11 : i64} {
  func.func @_policy_kernel(%arg0: memref<8x32xf32, #tpu.memory_space<vmem>>, %arg1: memref<4x32x32xf32, #tpu.memory_space<vmem>>, %arg2: memref<4x1x32xf32, #tpu.memory_space<vmem>>, %arg3: memref<32x128xf32, #tpu.memory_space<vmem>>, %arg4: memref<1x128xf32, #tpu.memory_space<vmem>>, %arg5: memref<8x128xf32, #tpu.memory_space<vmem>>) attributes {dimension_semantics = [], scalar_prefetch = 0 : i64, scratch_operands = 0 : i64, tpu.core_type = #tpu.core_type<tc>} {
    %c0 = arith.constant 0 : index
    %c0_0 = arith.constant 0 : index
    %0 = vector.load %arg0[%c0, %c0_0] : memref<8x32xf32, #tpu.memory_space<vmem>>, vector<8x32xf32>
    %c0_1 = arith.constant 0 : index
    %c0_2 = arith.constant 0 : index
    %c0_3 = arith.constant 0 : index
    %1 = vector.load %arg1[%c0_1, %c0_2, %c0_3] : memref<4x32x32xf32, #tpu.memory_space<vmem>>, vector<1x32x32xf32>
    %2 = vector.shape_cast %1 : vector<1x32x32xf32> to vector<32x32xf32>
    %cst = arith.constant dense<0.000000e+00> : vector<8x32xf32>
    %3 = tpu.matmul %0, %2, %cst {dimension_numbers = #tpu.dot_dimension_numbers<[1], [0], [0], [1], [0, 0, 1, 1], [], []>} : vector<8x32xf32>, vector<32x32xf32>, vector<8x32xf32> -> vector<8x32xf32>
    %c0_4 = arith.constant 0 : index
    %c0_5 = arith.constant 0 : index
    %c0_6 = arith.constant 0 : index
    %4 = vector.load %arg2[%c0_4, %c0_5, %c0_6] : memref<4x1x32xf32, #tpu.memory_space<vmem>>, vector<1x1x32xf32>
    %5 = vector.shape_cast %4 : vector<1x1x32xf32> to vector<1x32xf32>
    %6 = vector.broadcast %5 : vector<1x32xf32> to vector<8x32xf32>
    %7 = arith.addf %3, %6 : vector<8x32xf32>
    %cst_7 = arith.constant 0.000000e+00 : f32
    %8 = vector.broadcast %cst_7 : f32 to vector<8x32xf32>
    %9 = arith.maximumf %7, %8 : vector<8x32xf32>
    %c1 = arith.constant 1 : index
    %c0_8 = arith.constant 0 : index
    %c0_9 = arith.constant 0 : index
    %10 = vector.load %arg1[%c1, %c0_8, %c0_9] : memref<4x32x32xf32, #tpu.memory_space<vmem>>, vector<1x32x32xf32>
    %11 = vector.shape_cast %10 : vector<1x32x32xf32> to vector<32x32xf32>
    %cst_10 = arith.constant dense<0.000000e+00> : vector<8x32xf32>
    %12 = tpu.matmul %9, %11, %cst_10 {dimension_numbers = #tpu.dot_dimension_numbers<[1], [0], [0], [1], [0, 0, 1, 1], [], []>} : vector<8x32xf32>, vector<32x32xf32>, vector<8x32xf32> -> vector<8x32xf32>
    %c1_11 = arith.constant 1 : index
    %c0_12 = arith.constant 0 : index
    %c0_13 = arith.constant 0 : index
    %13 = vector.load %arg2[%c1_11, %c0_12, %c0_13] : memref<4x1x32xf32, #tpu.memory_space<vmem>>, vector<1x1x32xf32>
    %14 = vector.shape_cast %13 : vector<1x1x32xf32> to vector<1x32xf32>
    %15 = vector.broadcast %14 : vector<1x32xf32> to vector<8x32xf32>
    %16 = arith.addf %12, %15 : vector<8x32xf32>
    %cst_14 = arith.constant 0.000000e+00 : f32
    %17 = vector.broadcast %cst_14 : f32 to vector<8x32xf32>
    %18 = arith.maximumf %16, %17 : vector<8x32xf32>
    %c2 = arith.constant 2 : index
    %c0_15 = arith.constant 0 : index
    %c0_16 = arith.constant 0 : index
    %19 = vector.load %arg1[%c2, %c0_15, %c0_16] : memref<4x32x32xf32, #tpu.memory_space<vmem>>, vector<1x32x32xf32>
    %20 = vector.shape_cast %19 : vector<1x32x32xf32> to vector<32x32xf32>
    %cst_17 = arith.constant dense<0.000000e+00> : vector<8x32xf32>
    %21 = tpu.matmul %18, %20, %cst_17 {dimension_numbers = #tpu.dot_dimension_numbers<[1], [0], [0], [1], [0, 0, 1, 1], [], []>} : vector<8x32xf32>, vector<32x32xf32>, vector<8x32xf32> -> vector<8x32xf32>
    %c2_18 = arith.constant 2 : index
    %c0_19 = arith.constant 0 : index
    %c0_20 = arith.constant 0 : index
    %22 = vector.load %arg2[%c2_18, %c0_19, %c0_20] : memref<4x1x32xf32, #tpu.memory_space<vmem>>, vector<1x1x32xf32>
    %23 = vector.shape_cast %22 : vector<1x1x32xf32> to vector<1x32xf32>
    %24 = vector.broadcast %23 : vector<1x32xf32> to vector<8x32xf32>
    %25 = arith.addf %21, %24 : vector<8x32xf32>
    %cst_21 = arith.constant 0.000000e+00 : f32
    %26 = vector.broadcast %cst_21 : f32 to vector<8x32xf32>
    %27 = arith.maximumf %25, %26 : vector<8x32xf32>
    %c3 = arith.constant 3 : index
    %c0_22 = arith.constant 0 : index
    %c0_23 = arith.constant 0 : index
    %28 = vector.load %arg1[%c3, %c0_22, %c0_23] : memref<4x32x32xf32, #tpu.memory_space<vmem>>, vector<1x32x32xf32>
    %29 = vector.shape_cast %28 : vector<1x32x32xf32> to vector<32x32xf32>
    %cst_24 = arith.constant dense<0.000000e+00> : vector<8x32xf32>
    %30 = tpu.matmul %27, %29, %cst_24 {dimension_numbers = #tpu.dot_dimension_numbers<[1], [0], [0], [1], [0, 0, 1, 1], [], []>} : vector<8x32xf32>, vector<32x32xf32>, vector<8x32xf32> -> vector<8x32xf32>
    %c3_25 = arith.constant 3 : index
    %c0_26 = arith.constant 0 : index
    %c0_27 = arith.constant 0 : index
    %31 = vector.load %arg2[%c3_25, %c0_26, %c0_27] : memref<4x1x32xf32, #tpu.memory_space<vmem>>, vector<1x1x32xf32>
    %32 = vector.shape_cast %31 : vector<1x1x32xf32> to vector<1x32xf32>
    %33 = vector.broadcast %32 : vector<1x32xf32> to vector<8x32xf32>
    %34 = arith.addf %30, %33 : vector<8x32xf32>
    %cst_28 = arith.constant 0.000000e+00 : f32
    %35 = vector.broadcast %cst_28 : f32 to vector<8x32xf32>
    %36 = arith.maximumf %34, %35 : vector<8x32xf32>
    %c0_29 = arith.constant 0 : index
    %c0_30 = arith.constant 0 : index
    %37 = vector.load %arg3[%c0_29, %c0_30] : memref<32x128xf32, #tpu.memory_space<vmem>>, vector<32x128xf32>
    %cst_31 = arith.constant dense<0.000000e+00> : vector<8x128xf32>
    %38 = tpu.matmul %36, %37, %cst_31 {dimension_numbers = #tpu.dot_dimension_numbers<[1], [0], [0], [1], [0, 0, 1, 1], [], []>} : vector<8x32xf32>, vector<32x128xf32>, vector<8x128xf32> -> vector<8x128xf32>
    %c0_32 = arith.constant 0 : index
    %c0_33 = arith.constant 0 : index
    %39 = vector.load %arg4[%c0_32, %c0_33] : memref<1x128xf32, #tpu.memory_space<vmem>>, vector<1x128xf32>
    %40 = vector.broadcast %39 : vector<1x128xf32> to vector<8x128xf32>
    %41 = arith.addf %38, %40 : vector<8x128xf32>
    %42 = tpu.iota {dimensions = array<i32: 1>} : vector<8x128xi32>
    %43 = math.tanh %41 : vector<8x128xf32>
    %cst_34 = arith.constant -2.000000e+01 : f32
    %cst_35 = arith.constant 2.000000e+00 : f32
    %44 = vector.broadcast %cst_34 : f32 to vector<8x128xf32>
    %45 = arith.maximumf %44, %41 : vector<8x128xf32>
    %46 = vector.broadcast %cst_35 : f32 to vector<8x128xf32>
    %47 = arith.minimumf %46, %45 : vector<8x128xf32>
    %48 = math.exp %47 : vector<8x128xf32>
    %cst_36 = arith.constant 1.000000e+00 : f32
    %49 = vector.broadcast %cst_36 : f32 to vector<8x128xf32>
    %50 = arith.mulf %48, %49 : vector<8x128xf32>
    %c8_i32 = arith.constant 8 : i32
    %51 = vector.broadcast %c8_i32 : i32 to vector<8x128xi32>
    %52 = arith.cmpi slt, %42, %51 : vector<8x128xi32>
    %53 = arith.select %52, %43, %50 : vector<8x128xi1>, vector<8x128xf32>
    %c0_37 = arith.constant 0 : index
    %c0_38 = arith.constant 0 : index
    %54 = vector.load %arg5[%c0_37, %c0_38] : memref<8x128xf32, #tpu.memory_space<vmem>>, vector<8x128xf32>
    tpu.vector_store %arg5[%c0_37, %c0_38], %53 {strides = array<i32>} : memref<8x128xf32, #tpu.memory_space<vmem>>, vector<8x128xf32>,
    return
  }
}

</mosaic_0001>

<bundles_post_ra>
// kernel: policy_forward.1
= control target key start
LH: loop header
LB: loop body
LE: loop exit
PB: predicated region body
PF: predicated region fallthrough
CT: control target
= control target key end

     0   :  { %10 = vsyncpa [#allocation3], 0  ;;  %s741_s0 = inlined_call_operand.vmem [shape: f32[8,32], index: 0, kind: input, shape index: {}]   ;;  %s742_s1 = inlined_call_operand.hbm [shape: f32[4,32,32], index: 1, kind: input, shape index: {}]   ;;  %s743_s2 = inlined_call_operand.vmem [shape: f32[4,1,32], index: 2, kind: input, shape index: {}]   ;;  %s744_s3 = inlined_call_operand.hbm [shape: f32[32,128], index: 3, kind: input, shape index: {}]   ;;  %s745_s4 = inlined_call_operand.vmem [shape: f32[1,128], index: 4, kind: input, shape index: {}]   ;;  %s746_s5 = inlined_call_operand.vmem [shape: f32[8,128], index: 5, kind: output, shape index: {}]  }
   0x1   :  { %11 = vsyncpa [#allocation5], 0  ;;  %s643_s18 = smov [#allocation2]  }
   0x2   :  { %s19_s19 = sshll.u32 %s643_s18, 4  ;;  %s20_s19 = int_to_ptr.vmem [resolvable:$true] %s19_s19 }
   0x3   :  { %s607_s20 = scalar_lea.vmem %s20_s19, 2048  ;;  %p612_p1 = scmp.lt.s32.totalorder %s20_s19, %s20_s19 }
   0x4   :  { %p608_p0 = scmp.ne.s32.totalorder %s20_s19, %s607_s20  ;;  %p613_p2 = scmp.lt.s32.totalorder %s607_s20, %s607_s20 }
   0x6   :  { %p614_p3 = por %p613_p2, %p612_p1 }
   0x8   :  { %p615_p4 = pnand %p614_p3, %p608_p0 }
   0xa   :  { %618 = shalt.err (!%p615_p4)
}
   0xb   :  { %s644_s21 = smov 128   ;;  %s645_s22 = smov 8  }
   0xc   :  { %25 = dma.hbm_to_vmem [thread:$0]  %s742_s1, 2048, %s20_s19, [#allocation3], %s644_s21, %s644_s21, %s645_s22  }
   0xd   :  { %s646_s25 = smov [#allocation4]  }
   0xe   :  { %s33_s26 = sshll.u32 %s646_s25, 4  ;;  %s34_s26 = int_to_ptr.vmem [resolvable:$true] %s33_s26 }
   0xf   :  { %s627_s27 = scalar_lea.vmem %s34_s26, 512  ;;  %p632_p6 = scmp.lt.s32.totalorder %s34_s26, %s34_s26 }
  0x10   :  { %p628_p5 = scmp.ne.s32.totalorder %s34_s26, %s627_s27  ;;  %p633_p7 = scmp.lt.s32.totalorder %s627_s27, %s627_s27 }
  0x12   :  { %p634_p8 = por %p633_p7, %p632_p6 }
  0x14   :  { %p635_p9 = pnand %p634_p8, %p628_p5 }
  0x16   :  { %638 = shalt.err (!%p635_p9)
}
  0x17   :  { %39 = dma.hbm_to_vmem [thread:$0]  %s744_s3, 512, %s34_s26, [#allocation5], %s644_s21, %s644_s21, %s645_s22  }
  0x18   :  { %639 = dma.done.wait [#allocation3], 2048  }
  0x19   :  { %640 = vsyncadd [#allocation3], 4294965248 }
  0x1a   :  { %641 = dma.done.wait [#allocation5], 512  }
  0x1b   :  { %642 = vsyncadd [#allocation5], 4294966784  ;;  %v647_v0 = vmov 0.0   ;;  %vm648_vm0 = vmmov 0   ;;  %v52_v1 = vld [vmem:[#allocation2 + $0x18] sm:$0xff]  ;;  %v51_v2 = vld [vmem:[#allocation2 + $0x10] sm:$0xff]  ;;  %v480_v49 = vlaneseq }
  0x1c   :  { %534 = vmatprep.subr.mxu0 %v647_v0  ;;  %542 = vmatprep.mubr.msk.f32.mxu0 %vm648_vm0, %v647_v0  ;;  %v139_v3 = vld [vmem:[#allocation2 + $0x38] sm:$0xff]  ;;  %v50_v4 = vld [vmem:[#allocation2 + $0x8] sm:$0xff]  ;;  %v49_v5 = vld [vmem:[#allocation2] sm:$0xff]  ;;  %vm60_vm1 = vcmask 261120  }
  0x1d   :  { %545 = vmatprep.subr.mxu1 %v647_v0  ;;  %553 = vmatprep.mubr.msk.f32.mxu1 %vm648_vm0, %v647_v0  ;;  %v48_v6 = vld [vmem:[%s741_s0] sm:$0xff]  ;;  %v138_v7 = vld [vmem:[#allocation2 + $0x30] sm:$0xff]  ;;  %v137_v8 = vld [vmem:[#allocation2 + $0x28] sm:$0xff]  ;;  %v481_v50 = vand.u32 127, %v480_v49 }
  0x1e   :  { %535 = vmatpush3.msra.mxu0 %v52_v1  ;;  %546 = vmatpush3.msra.mxu1 %v139_v3  ;;  %v136_v9 = vld [vmem:[#allocation2 + $0x20] sm:$0xff]  ;;  %v226_v10 = vld [vmem:[#allocation2 + $0x58] sm:$0xff]  ;;  %v225_v16 = vld [vmem:[#allocation2 + $0x50] sm:$0xff] }
  0x1f   :  { %536 = vmatprep.subr.mxu0 %v647_v0  ;;  %547 = vmatprep.subr.mxu1 %v647_v0  ;;  %v496_v11 = vld [vmem:[%s743_s2] ss:$0 sm:$0xff]  ;;  %v224_v17 = vld [vmem:[#allocation2 + $0x48] sm:$0xff]  ;;  %v313_v19 = vld [vmem:[#allocation2 + $0x78] sm:$0xff]  ;;  %vm487_vm2 = vcmp.lt.s32.totalorder %v481_v50, 8 }
  0x20   :  { %537 = vmatpush3.msra.mxu0 %v51_v2  ;;  %548 = vmatpush3.msra.mxu1 %v138_v7  ;;  %v223_v18 = vld [vmem:[#allocation2 + $0x40] sm:$0xff]  ;;  %v312_v25 = vld [vmem:[#allocation2 + $0x70] sm:$0xff]  ;;  %v311_v26 = vld [vmem:[#allocation2 + $0x68] sm:$0xff] }
  0x21   :  { %538 = vmatprep.subr.mxu0 %v647_v0  ;;  %549 = vmatprep.subr.mxu1 %v647_v0  ;;  %v499_v20 = vld [vmem:[%s743_s2 + $0x1] ss:$0 sm:$0xff]  ;;  %v399_v28 = vld [vmem:[#allocation4 + $0x18] sm:$0xff]  ;;  %v502_v29 = vld [vmem:[%s743_s2 + $0x2] ss:$0 sm:$0xff] }
  0x22   :  { %539 = vmatpush3.msra.mxu0 %v50_v4  ;;  %550 = vmatpush3.msra.mxu1 %v137_v8  ;;  %v310_v27 = vld [vmem:[#allocation2 + $0x60] sm:$0xff]  ;;  %v398_v34 = vld [vmem:[#allocation4 + $0x10] sm:$0xff]  ;;  %v397_v35 = vld [vmem:[#allocation4 + $0x8] sm:$0xff] }
  0x23   :  { %540 = vmatprep.subr.mxu0 %v647_v0  ;;  %551 = vmatprep.subr.mxu1 %v647_v0  ;;  %v396_v36 = vld [vmem:[#allocation4] sm:$0xff] }
  0x24   :  { %541 = vmatpush3.msra.mxu0 %v49_v5  ;;  %552 = vmatpush3.msra.mxu1 %v136_v9  ;;  %v505_v37 = vld [vmem:[%s743_s2 + $0x3] ss:$0 sm:$0xff]  ;;  %v507_v42 = vld [vmem:[%s745_s4] ss:$0 sm:$0xff] }
  0x25   :  { %543 = vmatmul.mubr.msk.f32.vlgmr.msra.gmra.mxu0 %vm60_vm1, %v48_v6  ;;  %556 = vmatprep.subr.mxu0 %v647_v0 }
  0x26   :  { %564 = vmatprep.mubr.msk.f32.mxu0 %vm648_vm0, %v647_v0  ;;  %567 = vmatprep.subr.mxu1 %v647_v0 }
  0x27   :  { %557 = vmatpush3.msra.mxu0 %v226_v10 }
  0x28   :  { %558 = vmatprep.subr.mxu0 %v647_v0 }
  0x29   :  { %559 = vmatpush3.msra.mxu0 %v225_v16 }
  0x2a   :  { %560 = vmatprep.subr.mxu0 %v647_v0 }
  0x2b   :  { %561 = vmatpush3.msra.mxu0 %v224_v17 }
  0x2c   :  { %562 = vmatprep.subr.mxu0 %v647_v0 }
  0x2d   :  { %563 = vmatpush3.msra.mxu0 %v223_v18 }
  0x2e   :  { %578 = vmatprep.subr.mxu0 %v647_v0 }
  0xe5   :  { %v130_v12 = vpop.f32.mrf.mxu0 }
  0xe6   :  { %v131_v13 = vadd.f32 %v496_v11, %v130_v12 }
  0xe7   :  { %v544_v14 = vpop.f32.mrf.mxu0 }
  0xe8   :  { %v134_v15 = vmax.f32 %v131_v13, 0.0 }
  0xea   :  { %554 = vmatmul.mubr.msk.f32.vlgmr.msra.gmra.mxu1 %vm60_vm1, %v134_v15 }
  0xeb   :  { %575 = vmatprep.mubr.msk.f32.mxu1 %vm648_vm0, %v647_v0  ;;  %568 = vmatpush3.msra.mxu1 %v313_v19 }
  0xec   :  { %569 = vmatprep.subr.mxu1 %v647_v0 }
  0xed   :  { %570 = vmatpush3.msra.mxu1 %v312_v25 }
  0xee   :  { %571 = vmatprep.subr.mxu1 %v647_v0 }
  0xef   :  { %572 = vmatpush3.msra.mxu1 %v311_v26 }
  0xf0   :  { %573 = vmatprep.subr.mxu1 %v647_v0 }
  0xf1   :  { %574 = vmatpush3.msra.mxu1 %v310_v27 }
 0x1aa   :  { %v217_v21 = vpop.f32.mrf.mxu1 }
 0x1ab   :  { %v218_v22 = vadd.f32 %v499_v20, %v217_v21 }
 0x1ac   :  { %v555_v23 = vpop.f32.mrf.mxu1 }
 0x1ad   :  { %v221_v24 = vmax.f32 %v218_v22, 0.0 }
 0x1af   :  { %565 = vmatmul.mubr.msk.f32.vlgmr.msra.gmra.mxu0 %vm60_vm1, %v221_v24 }
 0x1b0   :  { %586 = vmatprep.mubr.msk.f32.mxu0 %vm648_vm0, %v647_v0  ;;  %579 = vmatpush3.msra.mxu0 %v399_v28 }
 0x1b1   :  { %580 = vmatprep.subr.mxu0 %v647_v0 }
 0x1b2   :  { %581 = vmatpush3.msra.mxu0 %v398_v34 }
 0x1b3   :  { %582 = vmatprep.subr.mxu0 %v647_v0 }
 0x1b4   :  { %583 = vmatpush3.msra.mxu0 %v397_v35 }
 0x1b5   :  { %584 = vmatprep.subr.mxu0 %v647_v0 }
 0x1b6   :  { %585 = vmatpush3.msra.mxu0 %v396_v36 }
 0x26f   :  { %v304_v30 = vpop.f32.mrf.mxu0 }
 0x270   :  { %v305_v31 = vadd.f32 %v502_v29, %v304_v30 }
 0x271   :  { %v566_v32 = vpop.f32.mrf.mxu0 }
 0x272   :  { %v308_v33 = vmax.f32 %v305_v31, 0.0 }
 0x274   :  { %576 = vmatmul.mubr.msk.f32.vlgmr.msra.gmra.mxu1 %vm60_vm1, %v308_v33 }
 0x334   :  { %v391_v38 = vpop.f32.mrf.mxu1 }
 0x335   :  { %v392_v39 = vadd.f32 %v505_v37, %v391_v38 }
 0x336   :  { %v577_v40 = vpop.f32.mrf.mxu1 }
 0x337   :  { %v395_v41 = vmax.f32 %v392_v39, 0.0 }
 0x339   :  { %587 = vmatmul.mubr.msk.f32.vlgmr.msra.gmra.mxu0 %vm60_vm1, %v395_v41 }
 0x3f9   :  { %v476_v43 = vpop.f32.mrf.mxu0 }
 0x3fa   :  { %v477_v44 = vadd.f32 %v507_v42, %v476_v43 }
 0x3fb   :  { %v588_v45 = vpop.f32.mrf.mxu0 }
 0x3fc   :  { %v483_v46 = vmax.f32 %v477_v44, -20.0  ;;  %595 = vtanh.f32 %v477_v44 }
 0x3fe   :  { %v484_v47 = vmin.f32 %v483_v46, 2.0 }
 0x400   :  { %v485_v48 = vmul.f32 1.442695, %v484_v47 }
 0x402   :  { %597 = vpow2.f32 %v485_v48 }
 0x409   :  { %v596_v51 = vpop.eup %595 }
 0x40f   :  { %v598_v52 = vpop.eup %597 }
 0x410   :  { %v488_v53 = vsel %vm487_vm2, %v596_v51, %v598_v52 }
 0x411   :  { %489 = vst [vmem:[%s746_s5] sm:$0xff] %v488_v53 }
 0x412   :  { %494 = vsyncpa [#allocation3], 1 }
 0x413   :  { %495 = vsyncpa [#allocation5], 1 }

</bundles_post_ra>
